<compile_context>
chip_gen: v5e
topology: v5e:2x2
jax: 0.10.0
libtpu: 0.0.40
codegen_flags: <defaults>
</compile_context>

<pallas_src>
import functools
import math

import jax
import jax.numpy as jnp
from jax import lax
from jax.experimental import pallas as pl
from jax.experimental.pallas import tpu as pltpu

# Deterministic stand-in for config.TEMPORAL_LOSS_WEIGHT
TEMPORAL_LOSS_WEIGHT = 0.5

_MAX_LANE_WIDTH = 64 * 1024        # cap on the lane-dense width g*T
_TARGET_TILE_ELEMS = 512 * 1024    # ~2 MiB of f32 per input tile


def _dual_loss_kernel(x_ref, y_ref, p_ref, t_ref, *,
                      seq_len, width, block_rows, tiles_per_core,
                      full_rows, rem_cols, compute_temporal):
    """One (block_rows, W) lane-dense tile: accumulate BCE and |temporal diff| sums
    into the per-core resident (8, W) output blocks."""
    c = pl.program_id(0)   # core split ("parallel")
    i = pl.program_id(1)   # row tiles per core ("arbitrary" / reduction)

    @pl.when(i == 0)
    def _init():
        p_ref[...] = jnp.zeros_like(p_ref)
        t_ref[...] = jnp.zeros_like(t_ref)

    # Logical (unclamped) tile index; the input index_map clamps, we mask here.
    tile = c * tiles_per_core + i

    x = x_ref[...].astype(jnp.float32)   # refined_scores (logits)
    y = y_ref[...].astype(jnp.float32)   # ground_truth_relevance (targets)

    # Element validity by flat index of the lane-dense view: element (r, w) has the
    # same flat index as the original (b, t) element, so valid <=> flat < B*T.
    row_ids = tile * block_rows + lax.broadcasted_iota(
        jnp.int32, (block_rows, width), 0)
    col_ids = lax.broadcasted_iota(jnp.int32, (block_rows, width), 1)
    valid = row_ids < full_rows
    if rem_cols:  # static Python branch
        valid = valid | ((row_ids == full_rows) & (col_ids < rem_cols))

    x = jnp.where(valid, x, 0.0)
    y = jnp.where(valid, y, 0.0)

    # Numerically stable BCEWithLogits:  max(x,0) - x*y + log(1 + exp(-|x|))
    bce = jnp.maximum(x, 0.0) - x * y + jnp.log1p(jnp.exp(-jnp.abs(x)))
    bce = jnp.where(valid, bce, 0.0)
    # Collapse row-groups of 8 with pure VPU adds (free leading-dim reshape),
    # accumulate into the lane-dense resident output block (unmasked dense store).
    p_ref[...] += jnp.sum(bce.reshape(-1, 8, width), axis=0)

    if compute_temporal:  # static Python flag — compiled out entirely when disabled
        # roll along lanes (XLU slot): x_prev[r, w] = x[r, w-1] (wrap at w=0 is masked).
        x_prev = pltpu.roll(x, shift=1, axis=1)
        diff = jnp.abs(x - x_prev)
        # lane % T == 0 positions are cross-row pairs (t == 0) -> excluded.
        tmask = valid & ((col_ids % seq_len) != 0)
        diff = jnp.where(tmask, diff, 0.0)
        t_ref[...] += jnp.sum(diff.reshape(-1, 8, width), axis=0)


def dual_objective_loss(refined_scores, raw_scores, ground_truth_relevance,
                        temporal_weight=TEMPORAL_LOSS_WEIGHT, block_rows=None):
    """Pallas implementation of DualObjectiveLoss.forward.

    Returns (total_loss, primary_loss, temporal_loss) as scalar float32 arrays.
    `raw_scores` is accepted but unused, matching the PyTorch forward.
    `temporal_weight` must be a static Python float (it gates kernel structure).
    """
    del raw_scores  # unused in the reference forward pass
    B, T = refined_scores.shape
    compute_temporal = bool(temporal_weight > 0) and (T > 1)

    # ---- lane-dense grouping: (B, T) -> (R, W), W = g*T multiple of 128 ----
    g = 128 // math.gcd(T, 128)
    if g * T > _MAX_LANE_WIDTH:
        g = 1  # fallback for huge T (lane padding is negligible there)
    W = g * T
    rows_align = 8 * g                          # keep R a multiple of 8
    B_pad = ((B + rows_align - 1) // rows_align) * rows_align
    R = B_pad // g

    def _dense(a):
        if B_pad != B:
            a = jnp.pad(a, ((0, B_pad - B), (0, 0)))   # zero pad; masked in-kernel
        return a.reshape(R, W)                          # free for contiguous arrays

    x2 = _dense(refined_scores)
    y2 = _dense(ground_truth_relevance)

    # ---- tile sizing on padded (= logical, since lane-dense) VMEM bytes ----
    if block_rows is None:
        br = max(8, (_TARGET_TILE_ELEMS // W) // 8 * 8)
    else:
        br = max(8, (int(block_rows) // 8) * 8)
    br = min(br, R)                              # R is a multiple of 8
    num_tiles = pl.cdiv(R, br)
    nc = 2 if num_tiles >= 2 else 1              # use both TCs on v7x; no-op on v5e/v6e
    tpc = pl.cdiv(num_tiles, nc)

    full_rows, rem_cols = divmod(B * T, W)

    kernel = functools.partial(
        _dual_loss_kernel,
        seq_len=T, width=W, block_rows=br, tiles_per_core=tpc,
        full_rows=full_rows, rem_cols=rem_cols,
        compute_temporal=compute_temporal)

    itemsize = refined_scores.dtype.itemsize
    cost = pl.CostEstimate(
        flops=9 * B * T,
        transcendentals=2 * B * T,
        bytes_accessed=2 * B_pad * T * itemsize + 2 * nc * 8 * W * 4)

    # Clamp the DMA index for phantom tail tiles of the last core; the in-kernel
    # flat-index mask (computed from the unclamped logical tile) zeroes them out.
    in_map = lambda c, i: (jnp.minimum(c * tpc + i, num_tiles - 1), 0)
    out_map = lambda c, i: (c, 0)                # resident per-core accumulator block

    p_part, t_part = pl.pallas_call(
        kernel,
        out_shape=(
            jax.ShapeDtypeStruct((nc * 8, W), jnp.float32),
            jax.ShapeDtypeStruct((nc * 8, W), jnp.float32),
        ),
        grid=(nc, tpc),
        in_specs=[
            pl.BlockSpec((br, W), in_map),
            pl.BlockSpec((br, W), in_map),
        ],
        out_specs=(
            pl.BlockSpec((8, W), out_map),
            pl.BlockSpec((8, W), out_map),
        ),
        compiler_params=pltpu.CompilerParams(
            dimension_semantics=("parallel", "arbitrary"),
            vmem_limit_bytes=48 * 1024 * 1024,
        ),
        cost_estimate=cost,
    )(x2, y2)

    # Tiny cross-core / cross-lane reduce + the divisions happen once, outside.
    primary_loss = jnp.sum(p_part) * jnp.float32(1.0 / (B * T))
    if compute_temporal:
        temporal_loss = jnp.sum(t_part) * jnp.float32(1.0 / (B * (T - 1)))
    else:
        temporal_loss = jnp.float32(0.0)
    total_loss = primary_loss + jnp.float32(temporal_weight) * temporal_loss
    return total_loss, primary_loss, temporal_loss


def _reference(refined_scores, ground_truth_relevance, temporal_weight):
    """Pure-JAX reference for sanity checking."""
    x = refined_scores.astype(jnp.float32)
    y = ground_truth_relevance.astype(jnp.float32)
    bce = jnp.maximum(x, 0.0) - x * y + jnp.log1p(jnp.exp(-jnp.abs(x)))
    primary = jnp.mean(bce)
    temporal = jnp.float32(0.0)
    if temporal_weight > 0 and x.shape[1] > 1:
        temporal = jnp.mean(jnp.abs(x[:, 1:] - x[:, :-1]))
    return primary + temporal_weight * temporal, primary, temporal


def _check(B, T, key, block_rows=None, dtype=jnp.float32, atol=1e-5, rtol=1e-5):
    k1, k2, k3 = jax.random.split(key, 3)
    refined = jax.random.normal(k1, (B, T), dtype=jnp.float32).astype(dtype)
    raw = jax.random.normal(k2, (B, T), dtype=jnp.float32).astype(dtype)
    gt = (jax.random.uniform(k3, (B, T)) > 0.5).astype(dtype)

    total, primary, temporal = dual_objective_loss(
        refined, raw, gt, TEMPORAL_LOSS_WEIGHT, block_rows=block_rows)
    total = jax.block_until_ready(total)
    primary = jax.block_until_ready(primary)
    temporal = jax.block_until_ready(temporal)

    ref_total, ref_primary, ref_temporal = _reference(refined, gt, TEMPORAL_LOSS_WEIGHT)
    assert jnp.allclose(total, ref_total, atol=atol, rtol=rtol), (total, ref_total)
    assert jnp.allclose(primary, ref_primary, atol=atol, rtol=rtol), (primary, ref_primary)
    assert jnp.allclose(temporal, ref_temporal, atol=atol, rtol=rtol), (temporal, ref_temporal)


if __name__ == "__main__":
    key = jax.random.PRNGKey(0)
    k1, k2, k3, k4 = jax.random.split(key, 4)

    # Small shapes matching the module semantics: batch=2, temporal length=8.
    _check(B=2, T=8, key=k1)

    # Multi-tile path with the 2-way core split and a phantom (clamped+masked) tail
    # tile: B=3000, T=8 -> R=192, block_rows=40 -> 5 tiles -> grid (2, 3).
    _check(B=3000, T=8, key=k2, block_rows=40)

    # Non-power-of-two temporal length (checks the lane % T boundary mask, g=64).
    _check(B=10, T=6, key=k3)

    # bf16 inputs (halved HBM traffic path; cast to f32 inside the kernel).
    _check(B=20, T=16, key=k4, dtype=jnp.bfloat16, atol=1e-4, rtol=1e-4)

    print("KERNEL_OK")
</pallas_src>

<mosaic_0001>
module attributes {stable_mosaic.version = 11 : i64} {
  func.func @_dual_loss_kernel(%arg0: i32, %arg1: i32, %arg2: memref<8x128xf32, #tpu.memory_space<vmem>>, %arg3: memref<8x128xf32, #tpu.memory_space<vmem>>, %arg4: memref<8x128xf32, #tpu.memory_space<vmem>>, %arg5: memref<8x128xf32, #tpu.memory_space<vmem>>) attributes {dimension_semantics = [#tpu.dimension_semantics<parallel>, #tpu.dimension_semantics<arbitrary>], iteration_bounds = array<i64: 1, 1>, scalar_prefetch = 0 : i64, scratch_operands = 0 : i64, tpu.core_type = #tpu.core_type<tc>, window_params = [{transform_indices = @transform_0, window_bounds = array<i64: 8, 128>}, {transform_indices = @transform_1, window_bounds = array<i64: 8, 128>}, {transform_indices = @transform_2, window_bounds = array<i64: 8, 128>}, {transform_indices = @transform_3, window_bounds = array<i64: 8, 128>}]} {
    %c0_i32 = arith.constant 0 : i32
    %0 = arith.cmpi eq, %arg1, %c0_i32 : i32
    %1 = arith.extui %0 : i1 to i32
    %c0_i32_0 = arith.constant 0 : i32
    %2 = arith.cmpi ne, %1, %c0_i32_0 : i32
    scf.if %2 {
      %cst_29 = arith.constant 0.000000e+00 : f32
      %70 = vector.broadcast %cst_29 : f32 to vector<8x128xf32>
      %c0_30 = arith.constant 0 : index
      %c0_31 = arith.constant 0 : index
      %71 = vector.load %arg4[%c0_30, %c0_31] : memref<8x128xf32, #tpu.memory_space<vmem>>, vector<8x128xf32>
      tpu.vector_store %arg4[%c0_30, %c0_31], %70 {strides = array<i32>} : memref<8x128xf32, #tpu.memory_space<vmem>>, vector<8x128xf32>,
      %cst_32 = arith.constant 0.000000e+00 : f32
      %72 = vector.broadcast %cst_32 : f32 to vector<8x128xf32>
      %c0_33 = arith.constant 0 : index
      %c0_34 = arith.constant 0 : index
      %73 = vector.load %arg5[%c0_33, %c0_34] : memref<8x128xf32, #tpu.memory_space<vmem>>, vector<8x128xf32>
      tpu.vector_store %arg5[%c0_33, %c0_34], %72 {strides = array<i32>} : memref<8x128xf32, #tpu.memory_space<vmem>>, vector<8x128xf32>,
    } else {
    }
    %c1_i32 = arith.constant 1 : i32
    %3 = arith.muli %arg0, %c1_i32 : i32
    %4 = arith.addi %3, %arg1 : i32
    %c0 = arith.constant 0 : index
    %c0_1 = arith.constant 0 : index
    %5 = vector.load %arg2[%c0, %c0_1] : memref<8x128xf32, #tpu.memory_space<vmem>>, vector<8x128xf32>
    %c0_2 = arith.constant 0 : index
    %c0_3 = arith.constant 0 : index
    %6 = vector.load %arg3[%c0_2, %c0_3] : memref<8x128xf32, #tpu.memory_space<vmem>>, vector<8x128xf32>
    %c8_i32 = arith.constant 8 : i32
    %7 = arith.muli %4, %c8_i32 : i32
    %8 = tpu.iota {dimensions = array<i32: 0>} : vector<8x128xi32>
    %9 = vector.broadcast %7 : i32 to vector<8x128xi32>
    %10 = arith.addi %9, %8 : vector<8x128xi32>
    %11 = tpu.iota {dimensions = array<i32: 1>} : vector<8x128xi32>
    %c0_i32_4 = arith.constant 0 : i32
    %12 = vector.broadcast %c0_i32_4 : i32 to vector<8x128xi32>
    %13 = arith.cmpi slt, %10, %12 : vector<8x128xi32>
    %c0_i32_5 = arith.constant 0 : i32
    %14 = vector.broadcast %c0_i32_5 : i32 to vector<8x128xi32>
    %15 = arith.cmpi eq, %10, %14 : vector<8x128xi32>
    %c16_i32 = arith.constant 16 : i32
    %16 = vector.broadcast %c16_i32 : i32 to vector<8x128xi32>
    %17 = arith.cmpi slt, %11, %16 : vector<8x128xi32>
    %18 = arith.andi %15, %17 : vector<8x128xi1>
    %19 = arith.ori %13, %18 : vector<8x128xi1>
    %cst = arith.constant 0.000000e+00 : f32
    %20 = vector.broadcast %cst : f32 to vector<8x128xf32>
    %21 = arith.select %19, %5, %20 : vector<8x128xi1>, vector<8x128xf32>
    %cst_6 = arith.constant 0.000000e+00 : f32
    %22 = vector.broadcast %cst_6 : f32 to vector<8x128xf32>
    %23 = arith.select %19, %6, %22 : vector<8x128xi1>, vector<8x128xf32>
    %cst_7 = arith.constant 0.000000e+00 : f32
    %24 = vector.broadcast %cst_7 : f32 to vector<8x128xf32>
    %25 = arith.maximumf %21, %24 : vector<8x128xf32>
    %26 = arith.mulf %21, %23 : vector<8x128xf32>
    %27 = arith.subf %25, %26 : vector<8x128xf32>
    %28 = math.absf %21 : vector<8x128xf32>
    %cst_8 = arith.constant 0.000000e+00 : f32
    %29 = vector.broadcast %cst_8 : f32 to vector<8x128xf32>
    %30 = arith.subf %29, %28 : vector<8x128xf32>
    %31 = math.exp %30 : vector<8x128xf32>
    %32 = math.log1p %31 : vector<8x128xf32>
    %33 = arith.addf %27, %32 : vector<8x128xf32>
    %cst_9 = arith.constant 0.000000e+00 : f32
    %34 = vector.broadcast %cst_9 : f32 to vector<8x128xf32>
    %35 = arith.select %19, %33, %34 : vector<8x128xi1>, vector<8x128xf32>
    %c0_10 = arith.constant 0 : index
    %c0_11 = arith.constant 0 : index
    %36 = vector.load %arg4[%c0_10, %c0_11] : memref<8x128xf32, #tpu.memory_space<vmem>>, vector<8x128xf32>
    %37 = vector.shape_cast %35 : vector<8x128xf32> to vector<1x8x128xf32>
    %cst_12 = arith.constant dense<0.000000e+00> : vector<8x128xf32>
    %38 = vector.multi_reduction <add>, %37, %cst_12 [0] : vector<1x8x128xf32> to vector<8x128xf32>
    %39 = arith.addf %36, %38 : vector<8x128xf32>
    %c0_13 = arith.constant 0 : index
    %c0_14 = arith.constant 0 : index
    %40 = vector.load %arg4[%c0_13, %c0_14] : memref<8x128xf32, #tpu.memory_space<vmem>>, vector<8x128xf32>
    tpu.vector_store %arg4[%c0_13, %c0_14], %39 {strides = array<i32>} : memref<8x128xf32, #tpu.memory_space<vmem>>, vector<8x128xf32>,
    %c1_i32_15 = arith.constant 1 : i32
    %41 = tpu.dynamic_rotate %21 by %c1_i32_15 dim 1 : vector<8x128xf32>, i32 -> vector<8x128xf32>
    %42 = arith.subf %21, %41 : vector<8x128xf32>
    %43 = math.absf %42 : vector<8x128xf32>
    %c8_i32_16 = arith.constant 8 : i32
    %c0_i32_17 = arith.constant 0 : i32
    %44 = arith.cmpi eq, %c8_i32_16, %c0_i32_17 : i32
    %c1_i32_18 = arith.constant 1 : i32
    %45 = arith.select %44, %c1_i32_18, %c8_i32_16 : i32
    %46 = vector.broadcast %45 : i32 to vector<8x128xi32>
    %47 = arith.remsi %11, %46 : vector<8x128xi32>
    %c0_i32_19 = arith.constant 0 : i32
    %48 = vector.broadcast %c0_i32_19 : i32 to vector<8x128xi32>
    %49 = arith.cmpi ne, %47, %48 : vector<8x128xi32>
    %c0_i32_20 = arith.constant 0 : i32
    %50 = vector.broadcast %c0_i32_20 : i32 to vector<8x128xi32>
    %51 = arith.cmpi slt, %47, %50 : vector<8x128xi32>
    %c0_i32_21 = arith.constant 0 : i32
    %52 = arith.cmpi slt, %45, %c0_i32_21 : i32
    %53 = vector.broadcast %52 : i1 to vector<8x128xi1>
    %54 = vector.broadcast %53 : vector<8x128xi1> to vector<8x128xi1>
    %55 = arith.xori %51, %54 : vector<8x128xi1>
    %56 = arith.andi %55, %49 : vector<8x128xi1>
    %57 = vector.broadcast %45 : i32 to vector<8x128xi32>
    %58 = arith.addi %47, %57 : vector<8x128xi32>
    %59 = arith.select %56, %58, %47 : vector<8x128xi1>, vector<8x128xi32>
    %c0_i32_22 = arith.constant 0 : i32
    %60 = vector.broadcast %c0_i32_22 : i32 to vector<8x128xi32>
    %61 = arith.cmpi ne, %59, %60 : vector<8x128xi32>
    %62 = arith.andi %19, %61 : vector<8x128xi1>
    %cst_23 = arith.constant 0.000000e+00 : f32
    %63 = vector.broadcast %cst_23 : f32 to vector<8x128xf32>
    %64 = arith.select %62, %43, %63 : vector<8x128xi1>, vector<8x128xf32>
    %c0_24 = arith.constant 0 : index
    %c0_25 = arith.constant 0 : index
    %65 = vector.load %arg5[%c0_24, %c0_25] : memref<8x128xf32, #tpu.memory_space<vmem>>, vector<8x128xf32>
    %66 = vector.shape_cast %64 : vector<8x128xf32> to vector<1x8x128xf32>
    %cst_26 = arith.constant dense<0.000000e+00> : vector<8x128xf32>
    %67 = vector.multi_reduction <add>, %66, %cst_26 [0] : vector<1x8x128xf32> to vector<8x128xf32>
    %68 = arith.addf %65, %67 : vector<8x128xf32>
    %c0_27 = arith.constant 0 : index
    %c0_28 = arith.constant 0 : index
    %69 = vector.load %arg5[%c0_27, %c0_28] : memref<8x128xf32, #tpu.memory_space<vmem>>, vector<8x128xf32>
    tpu.vector_store %arg5[%c0_27, %c0_28], %68 {strides = array<i32>} : memref<8x128xf32, #tpu.memory_space<vmem>>, vector<8x128xf32>,
    return
  }
  func.func @transform_0(%arg0: i32, %arg1: i32) -> (i32, i32) {
    %c1_i32 = arith.constant 1 : i32
    %0 = arith.muli %arg0, %c1_i32 : i32
    %1 = arith.addi %0, %arg1 : i32
    %c0_i32 = arith.constant 0 : i32
    %2 = arith.minsi %1, %c0_i32 : i32
    %c0_i32_0 = arith.constant 0 : i32
    %c0_i32_1 = arith.constant 0 : i32
    return %2, %c0_i32_0 : i32, i32
  }
  func.func @transform_1(%arg0: i32, %arg1: i32) -> (i32, i32) {
    %c1_i32 = arith.constant 1 : i32
    %0 = arith.muli %arg0, %c1_i32 : i32
    %1 = arith.addi %0, %arg1 : i32
    %c0_i32 = arith.constant 0 : i32
    %2 = arith.minsi %1, %c0_i32 : i32
    %c0_i32_0 = arith.constant 0 : i32
    %c0_i32_1 = arith.constant 0 : i32
    return %2, %c0_i32_0 : i32, i32
  }
  func.func @transform_2(%arg0: i32, %arg1: i32) -> (i32, i32) {
    %c0_i32 = arith.constant 0 : i32
    %c0_i32_0 = arith.constant 0 : i32
    return %arg0, %c0_i32 : i32, i32
  }
  func.func @transform_3(%arg0: i32, %arg1: i32) -> (i32, i32) {
    %c0_i32 = arith.constant 0 : i32
    %c0_i32_0 = arith.constant 0 : i32
    return %arg0, %c0_i32 : i32, i32
  }
}

</mosaic_0001>

<bundles_post_ra>
// kernel: tpu_custom_call.1
= control target key start
LH: loop header
LB: loop body
LE: loop exit
PB: predicated region body
PF: predicated region fallthrough
CT: control target
= control target key end

     0   :  { %9 = vsyncpa [#allocation3], 0  ;;  %s328_s0 = inlined_call_operand.hbm [shape: f32[8,128], index: 0, kind: input, shape index: {}]   ;;  %s329_s1 = inlined_call_operand.hbm [shape: f32[8,128], index: 1, kind: input, shape index: {}]   ;;  %s330_s2 = inlined_call_operand.hbm [shape: f32[8,128], index: 2, kind: output, shape index: {0}]   ;;  %s331_s3 = inlined_call_operand.hbm [shape: f32[8,128], index: 3, kind: output, shape index: {1}]  }
   0x1   :  { %10 = vsyncpa [#allocation6], 0 }
   0x2   :  { %11 = vsyncpa [#allocation4], 0 }
   0x3   :  { %12 = vsyncpa [#allocation9], 0  ;;  %s23_s14 = sshll.u32 %s328_s0, 4  ;;  %s279_s15 = smov [#allocation2]   ;;  %s24_s14 = int_to_ptr.hbm [resolvable:$true] %s23_s14 }
   0x4   :  { %s25_s16 = sshll.u32 %s279_s15, 4  ;;  %s39_s19 = sshll.u32 %s329_s1, 4  ;;  %s26_s16 = int_to_ptr.vmem [resolvable:$true] %s25_s16  ;;  %s40_s19 = int_to_ptr.hbm [resolvable:$true] %s39_s19 }
   0x5   :  { %28 = dma.hbm_to_vmem [thread:$0]  %s24_s14, 128, %s26_s16, [#allocation3]  }
   0x6   :  { %s280_s20 = smov [#allocation5]  }
   0x7   :  { %s41_s21 = sshll.u32 %s280_s20, 4  ;;  %s42_s21 = int_to_ptr.vmem [resolvable:$true] %s41_s21 }
   0x8   :  { %44 = dma.hbm_to_vmem [thread:$0]  %s40_s19, 128, %s42_s21, [#allocation6]  }
   0x9   :  { %271 = dma.done.wait [#allocation3], 128  }
   0xa   :  { %272 = vsyncadd [#allocation3], 4294967168 }
   0xb   :  { %273 = dma.done.wait [#allocation6], 128  }
   0xc   :  { %274 = vsyncadd [#allocation6], 4294967168  ;;  %v69_v0 = vlaneseq  ;;  %v66_v4 = vld [vmem:[#allocation2] sm:$0xff]  ;;  %s281_s0 = smov 1   ;;  %v67_v10 = vld [vmem:[#allocation5] sm:$0xff]  ;;  %s282_s1 = smov [#allocation7]  }
   0xd   :  { %s132_s22 = sshll.u32 %s282_s1, 4  ;;  %s134_s25 = sshll.u32 %s330_s2, 4  ;;  %s133_s22 = int_to_ptr.vmem [resolvable:$true] %s132_s22  ;;  %s135_s25 = int_to_ptr.hbm [resolvable:$true] %s134_s25 }
   0xe   :  { %v70_v1 = vshrl.u32 %v69_v0, 7  ;;  %v74_v2 = vand.u32 127, %v69_v0  ;;  %s283_s26 = smov [#allocation8]   ;;  %s145_s2 = sshll.u32 %s331_s3, 4  ;;  %s146_s2 = int_to_ptr.hbm [resolvable:$true] %s145_s2 }
   0xf   :  { %s143_s27 = sshll.u32 %s283_s26, 4  ;;  %s144_s27 = int_to_ptr.vmem [resolvable:$true] %s143_s27 }
  0x10   :  { %vm76_vm0 = vcmp.eq.s32.totalorder %v70_v1, 0  ;;  %vm77_vm1 = vcmp.lt.s32.totalorder %v74_v2, 16  ;;  %v112_v25 = vand.u32 7, %v74_v2 }
  0x11   :  { %vm310_vm2 = vmand %vm76_vm0, %vm77_vm1 }
  0x12   :  { %v80_v5 = vsel %vm310_vm2, %v66_v4, 0.0  ;;  %v81_v12 = vsel %vm310_vm2, %v67_v10, 0.0  ;;  %vm120_vm4 = vcmp.ne.s32.totalorder %v112_v25, 0 }
  0x13   :  { %104 = vrot.lane.b32.xlu0 %v80_v5, %s281_s0  ;;  %v85_v6 = vand.u32 2147483647, %v80_v5  ;;  %v82_v14 = vmax.f32 %v80_v5, 0.0  ;;  %v83_v15 = vmul.f32 %v81_v12, %v80_v5  ;;  %vm121_vm5 = vmand %vm310_vm2, %vm120_vm4 }
  0x15   :  { %v86_v7 = vsub.f32 0.0, %v85_v6  ;;  %v84_v21 = vsub.f32 %v82_v14, %v83_v15 }
  0x17   :  { %v87_v8 = vmul.f32 1.442695, %v86_v7 }
  0x19   :  { %171 = vpow2.f32 %v87_v8 }
  0x1f   :  { %v172_v9 = vpop.eup %171 }
  0x20   :  { %v89_v11 = vadd.f32 1.0, %v172_v9  ;;  %v92_v13 = vmul.f32 -0.5, %v172_v9  ;;  %v95_v18 = vand.u32 2147483647, %v172_v9 }
  0x22   :  { %173 = vlog2.f32 %v89_v11  ;;  %v93_v16 = vadd.f32 1.0, %v92_v13  ;;  %vm96_vm3 = vcmp.lt.f32.partialorder %v95_v18, 0.0004427343 }
  0x24   :  { %v94_v20 = vmul.f32 %v172_v9, %v93_v16 }
  0x28   :  { %v174_v17 = vpop.eup %173 }
  0x29   :  { %v91_v19 = vmul.f32 0.6931472, %v174_v17 }
  0x2b   :  { %v97_v22 = vsel %vm96_vm3, %v94_v20, %v91_v19 }
  0x2c   :  { %v98_v23 = vadd.f32 %v97_v22, %v84_v21 }
  0x2e   :  { %v99_v24 = vsel %vm310_vm2, %v98_v23, 0.0 }
  0x2f   :  { %103 = vst [vmem:[#allocation7] sm:$0xff] %v99_v24 }
  0x30   :  { %137 = dma.vmem_to_hbm [thread:$0]  %s133_s22, 128, %s135_s25, [#allocation4]  }
  0x85   :  { %v105_v26 = vpop.permute.xlu0 %104 }
  0x86   :  { %v106_v27 = vsub.f32 %v80_v5, %v105_v26 }
  0x88   :  { %v107_v28 = vand.u32 2147483647, %v106_v27 }
  0x8a   :  { %v122_v29 = vsel %vm121_vm5, %v107_v28, 0.0 }
  0x8b   :  { %126 = vst [vmem:[#allocation8] sm:$0xff] %v122_v29 }
  0x8c   :  { %148 = dma.vmem_to_hbm [thread:$0]  %s144_s27, 128, %s146_s2, [#allocation9]  }
  0x8d   :  { %275 = dma.done.wait [#allocation4], 128  }
  0x8e   :  { %276 = vsyncadd [#allocation4], 4294967168 }
  0x8f   :  { %277 = dma.done.wait [#allocation9], 128  }
  0x90   :  { %278 = vsyncadd [#allocation9], 4294967168 }
  0x91   :  { %157 = vsyncpa [#allocation3], 1 }
  0x92   :  { %158 = vsyncpa [#allocation6], 1 }
  0x93   :  { %159 = vsyncpa [#allocation4], 1 }
  0x94   :  { %160 = vsyncpa [#allocation9], 1 }

</bundles_post_ra>
